<compile_context>
chip_gen: v7x
topology: tpu7x:2x2x1
jax: 0.10.0
libtpu: 0.0.40
codegen_flags: <defaults>
</compile_context>

<pallas_src>
import functools

import jax
import jax.numpy as jnp
from jax.experimental import pallas as pl
from jax.experimental.pallas import tpu as pltpu

IN_DIM = 512
HID = 256
MU_DIM = 2
VAR_DIM = 2
DISC_DIM = 10
HEAD_RAW = MU_DIM + VAR_DIM + DISC_DIM   # 14
HEAD_PAD = 128                            # lane-dense fused head output
TB_MAX = 256                              # batch tile (full MXU rows on v6e/v7x)


def discq_kernel(x_ref, w1_ref, b1_ref, wh_ref, bh_ref, y_ref):
    # hidden: (TB, 512) @ (512, 256) -> (TB, 256), f32 accumulation
    h = jnp.dot(x_ref[...], w1_ref[...],
                preferred_element_type=jnp.float32) + b1_ref[...]
    # fused heads: (TB, 256) @ (256, 128) -> (TB, 128) lane-dense store
    y_ref[...] = jnp.dot(h.astype(wh_ref.dtype), wh_ref[...],
                         preferred_element_type=jnp.float32) + bh_ref[...]


def prepare_params(params):
    """One-time prep: fuse/pad head weights, cast matmul operands to bf16."""
    w1, b1, wmu, bmu, wvar, bvar, wd, bd = params
    w_heads = jnp.concatenate([wmu, wvar, wd], axis=1)        # (256, 14)
    w_heads = jnp.pad(w_heads, ((0, 0), (0, HEAD_PAD - HEAD_RAW)))
    b_heads = jnp.concatenate([bmu, bvar, bd], axis=1)        # (1, 14)
    b_heads = jnp.pad(b_heads, ((0, 0), (0, HEAD_PAD - HEAD_RAW)))
    return (w1.astype(jnp.bfloat16),
            b1.astype(jnp.float32),
            w_heads.astype(jnp.bfloat16),
            b_heads.astype(jnp.float32))


@functools.partial(jax.jit, static_argnames=())
def discq_forward(x, fused_params):
    w1, b1, wh, bh = fused_params
    B = x.shape[0]

    # Batch tiling: tile rows to a multiple of 8 (sublane), capped at TB_MAX.
    TB = min(TB_MAX, ((B + 7) // 8) * 8)
    n_tiles = pl.cdiv(B, TB)
    B_pad = n_tiles * TB

    x_p = jnp.pad(x, ((0, B_pad - B), (0, 0))).astype(jnp.bfloat16)

    flops = 2 * B_pad * (IN_DIM * HID + HID * HEAD_PAD)
    bytes_accessed = (B_pad * IN_DIM * 2 + IN_DIM * HID * 2 + HID * 4
                      + HID * HEAD_PAD * 2 + HEAD_PAD * 4
                      + B_pad * HEAD_PAD * 4)

    y = pl.pallas_call(
        discq_kernel,
        out_shape=jax.ShapeDtypeStruct((B_pad, HEAD_PAD), jnp.float32),
        grid=(n_tiles,),
        in_specs=[
            pl.BlockSpec((TB, IN_DIM), lambda i: (i, 0)),      # x tile
            pl.BlockSpec((IN_DIM, HID), lambda i: (0, 0)),     # w1 (resident)
            pl.BlockSpec((1, HID), lambda i: (0, 0)),          # b1 (resident)
            pl.BlockSpec((HID, HEAD_PAD), lambda i: (0, 0)),   # fused heads W
            pl.BlockSpec((1, HEAD_PAD), lambda i: (0, 0)),     # fused heads b
        ],
        out_specs=pl.BlockSpec((TB, HEAD_PAD), lambda i: (i, 0)),
        compiler_params=pltpu.CompilerParams(
            dimension_semantics=("parallel",)),
        cost_estimate=pl.CostEstimate(
            flops=flops, transcendentals=0, bytes_accessed=bytes_accessed),
    )(x_p, w1, b1, wh, bh)

    y = y[:B]
    mu = jnp.squeeze(y[:, :MU_DIM])
    var = jnp.squeeze(y[:, MU_DIM:MU_DIM + VAR_DIM])
    disc = jnp.squeeze(y[:, MU_DIM + VAR_DIM:HEAD_RAW])
    return mu, var, disc


def init_params(key):
    """Deterministic synthetic params, PyTorch-Linear-style uniform init.

    Weights are stored transposed: (in_features, out_features).
    """
    def linear(key, fan_in, fan_out):
        kw, kb = jax.random.split(key)
        bound = 1.0 / jnp.sqrt(fan_in)
        w = jax.random.uniform(kw, (fan_in, fan_out), jnp.float32, -bound, bound)
        b = jax.random.uniform(kb, (1, fan_out), jnp.float32, -bound, bound)
        return w, b

    k1, k2, k3, k4 = jax.random.split(key, 4)
    w1, b1 = linear(k1, IN_DIM, HID)
    wmu, bmu = linear(k2, HID, MU_DIM)
    wvar, bvar = linear(k3, HID, VAR_DIM)
    wd, bd = linear(k4, HID, DISC_DIM)
    return (w1, b1, wmu, bmu, wvar, bvar, wd, bd)


def reference_forward(x, params):
    """Pure-JAX f32 reference matching the torch forward()."""
    (w1, b1, wmu, bmu, wvar, bvar, wd, bd) = params
    h = x @ w1 + b1
    return (jnp.squeeze(h @ wmu + bmu),
            jnp.squeeze(h @ wvar + bvar),
            jnp.squeeze(h @ wd + bd))


if __name__ == "__main__":
    key = jax.random.PRNGKey(0)
    kx, kp = jax.random.split(key)

    B = 8  # small batch
    x = jax.random.normal(kx, (B, IN_DIM), jnp.float32)
    params = init_params(kp)
    fused = prepare_params(params)

    mu, var, disc = discq_forward(x, fused)
    jax.block_until_ready((mu, var, disc))

    # correctness check against an f32 pure-JAX reference (bf16 matmul inputs,
    # f32 accumulation -> loosened tolerance)
    mu_r, var_r, disc_r = reference_forward(x, params)
    assert mu.shape == (B, MU_DIM) and var.shape == (B, VAR_DIM) and disc.shape == (B, DISC_DIM)
    assert jnp.allclose(mu, mu_r, atol=5e-2, rtol=5e-2)
    assert jnp.allclose(var, var_r, atol=5e-2, rtol=5e-2)
    assert jnp.allclose(disc, disc_r, atol=5e-2, rtol=5e-2)

    print("KERNEL_OK")
</pallas_src>

<mosaic_0001>
module attributes {stable_mosaic.version = 11 : i64} {
  func.func @discq_kernel(%arg0: i32, %arg1: memref<8x512xbf16, #tpu.memory_space<vmem>>, %arg2: memref<512x256xbf16, #tpu.memory_space<vmem>>, %arg3: memref<1x256xf32, #tpu.memory_space<vmem>>, %arg4: memref<256x128xbf16, #tpu.memory_space<vmem>>, %arg5: memref<1x128xf32, #tpu.memory_space<vmem>>, %arg6: memref<8x128xf32, #tpu.memory_space<vmem>>) attributes {dimension_semantics = [#tpu.dimension_semantics<parallel>], iteration_bounds = array<i64: 1>, scalar_prefetch = 0 : i64, scratch_operands = 0 : i64, tpu.core_type = #tpu.core_type<tc>, window_params = [{transform_indices = @transform_0, window_bounds = array<i64: 8, 512>}, {pipeline_mode = #tpu.pipeline_mode<synchronous>, transform_indices = @transform_1, window_bounds = array<i64: 512, 256>}, {pipeline_mode = #tpu.pipeline_mode<synchronous>, transform_indices = @transform_2, window_bounds = array<i64: 1, 256>}, {pipeline_mode = #tpu.pipeline_mode<synchronous>, transform_indices = @transform_3, window_bounds = array<i64: 256, 128>}, {pipeline_mode = #tpu.pipeline_mode<synchronous>, transform_indices = @transform_4, window_bounds = array<i64: 1, 128>}, {transform_indices = @transform_5, window_bounds = array<i64: 8, 128>}]} {
    %c0 = arith.constant 0 : index
    %c0_0 = arith.constant 0 : index
    %0 = vector.load %arg1[%c0, %c0_0] : memref<8x512xbf16, #tpu.memory_space<vmem>>, vector<8x512xbf16>
    %c0_1 = arith.constant 0 : index
    %c0_2 = arith.constant 0 : index
    %1 = vector.load %arg2[%c0_1, %c0_2] : memref<512x256xbf16, #tpu.memory_space<vmem>>, vector<512x256xbf16>
    %cst = arith.constant dense<0.000000e+00> : vector<8x256xf32>
    %2 = tpu.matmul %0, %1, %cst {dimension_numbers = #tpu.dot_dimension_numbers<[1], [0], [0], [1], [0, 0, 1, 1], [], []>} : vector<8x512xbf16>, vector<512x256xbf16>, vector<8x256xf32> -> vector<8x256xf32>
    %c0_3 = arith.constant 0 : index
    %c0_4 = arith.constant 0 : index
    %3 = vector.load %arg3[%c0_3, %c0_4] : memref<1x256xf32, #tpu.memory_space<vmem>>, vector<1x256xf32>
    %4 = vector.broadcast %3 : vector<1x256xf32> to vector<8x256xf32>
    %5 = arith.addf %2, %4 : vector<8x256xf32>
    %6 = arith.truncf %5 : vector<8x256xf32> to vector<8x256xbf16>
    %c0_5 = arith.constant 0 : index
    %c0_6 = arith.constant 0 : index
    %7 = vector.load %arg4[%c0_5, %c0_6] : memref<256x128xbf16, #tpu.memory_space<vmem>>, vector<256x128xbf16>
    %cst_7 = arith.constant dense<0.000000e+00> : vector<8x128xf32>
    %8 = tpu.matmul %6, %7, %cst_7 {dimension_numbers = #tpu.dot_dimension_numbers<[1], [0], [0], [1], [0, 0, 1, 1], [], []>} : vector<8x256xbf16>, vector<256x128xbf16>, vector<8x128xf32> -> vector<8x128xf32>
    %c0_8 = arith.constant 0 : index
    %c0_9 = arith.constant 0 : index
    %9 = vector.load %arg5[%c0_8, %c0_9] : memref<1x128xf32, #tpu.memory_space<vmem>>, vector<1x128xf32>
    %10 = vector.broadcast %9 : vector<1x128xf32> to vector<8x128xf32>
    %11 = arith.addf %8, %10 : vector<8x128xf32>
    %c0_10 = arith.constant 0 : index
    %c0_11 = arith.constant 0 : index
    %12 = vector.load %arg6[%c0_10, %c0_11] : memref<8x128xf32, #tpu.memory_space<vmem>>, vector<8x128xf32>
    tpu.vector_store %arg6[%c0_10, %c0_11], %11 {strides = array<i32>} : memref<8x128xf32, #tpu.memory_space<vmem>>, vector<8x128xf32>,
    return
  }
  func.func @transform_0(%arg0: i32) -> (i32, i32) {
    %c0_i32 = arith.constant 0 : i32
    %c0_i32_0 = arith.constant 0 : i32
    return %arg0, %c0_i32 : i32, i32
  }
  func.func @transform_1(%arg0: i32) -> (i32, i32) {
    %c0_i32 = arith.constant 0 : i32
    %c0_i32_0 = arith.constant 0 : i32
    %c0_i32_1 = arith.constant 0 : i32
    return %c0_i32, %c0_i32_0 : i32, i32
  }
  func.func @transform_2(%arg0: i32) -> (i32, i32) {
    %c0_i32 = arith.constant 0 : i32
    %c0_i32_0 = arith.constant 0 : i32
    %c0_i32_1 = arith.constant 0 : i32
    return %c0_i32, %c0_i32_0 : i32, i32
  }
  func.func @transform_3(%arg0: i32) -> (i32, i32) {
    %c0_i32 = arith.constant 0 : i32
    %c0_i32_0 = arith.constant 0 : i32
    %c0_i32_1 = arith.constant 0 : i32
    return %c0_i32, %c0_i32_0 : i32, i32
  }
  func.func @transform_4(%arg0: i32) -> (i32, i32) {
    %c0_i32 = arith.constant 0 : i32
    %c0_i32_0 = arith.constant 0 : i32
    %c0_i32_1 = arith.constant 0 : i32
    return %c0_i32, %c0_i32_0 : i32, i32
  }
  func.func @transform_5(%arg0: i32) -> (i32, i32) {
    %c0_i32 = arith.constant 0 : i32
    %c0_i32_0 = arith.constant 0 : i32
    return %arg0, %c0_i32 : i32, i32
  }
}

</mosaic_0001>

<bundles_post_ra>
// kernel: discq_forward.1
= control target key start
LH: loop header
LB: loop body
LE: loop exit
PB: predicated region body
PF: predicated region fallthrough
CT: control target
= control target key end

     0   :  { %10 = vsyncpa [#allocation3], 0  ;;  %s1083_s0 = inlined_call_operand.vmem [shape: bf16[8,512], index: 0, kind: input, shape index: {}]   ;;  %s1084_s1 = inlined_call_operand.hbm [shape: bf16[512,256], index: 1, kind: input, shape index: {}]   ;;  %s1085_s2 = inlined_call_operand.vmem [shape: f32[1,256], index: 2, kind: input, shape index: {}]   ;;  %s1086_s3 = inlined_call_operand.hbm [shape: bf16[256,128], index: 3, kind: input, shape index: {}]   ;;  %s1087_s4 = inlined_call_operand.vmem [shape: f32[1,128], index: 4, kind: input, shape index: {}]   ;;  %s1088_s5 = inlined_call_operand.vmem [shape: f32[8,128], index: 5, kind: output, shape index: {}]  }
   0x1   :  { %11 = vsyncpa [#allocation5], 0  ;;  %s1008_s18 = smov [#allocation2]   ;;  %s960_s22 = scalar_lea.hbm %s1084_s1, 8192 }
   0x2   :  { %s19_s19 = sshll.u32 %s1008_s18, 4  ;;  %p961_p0 = scmp.ne.s32.totalorder %s1084_s1, %s960_s22  ;;  %s20_s19 = int_to_ptr.vmem [resolvable:$true] %s19_s19 }
   0x3   :  { %p964_p1 = scmp.lt.u32.totalorder %s960_s22, %s1084_s1 }
   0x5   :  { %p966_p2 = pnand %p964_p1, %p961_p0 }
   0x7   :  { %969 = shalt.err (!%p966_p2)
}
   0x8   :  { %s970_s27 = scalar_lea.vmem %s20_s19, 8192  ;;  %p975_p4 = scmp.lt.s32.totalorder %s20_s19, %s20_s19 }
   0x9   :  { %p971_p3 = scmp.ne.s32.totalorder %s20_s19, %s970_s27  ;;  %p976_p5 = scmp.lt.s32.totalorder %s970_s27, %s970_s27 }
   0xb   :  { %p977_p6 = por %p976_p5, %p975_p4 }
   0xd   :  { %p978_p7 = pnand %p977_p6, %p971_p3 }
   0xf   :  { %981 = shalt.err (!%p978_p7)
}
  0x10   :  { %s1009_s28 = smov 128   ;;  %s1010_s29 = smov 8  }
  0x11   :  { %25 = dma.hbm_to_vmem [thread:$0]  %s1084_s1, 8192, %s20_s19, [#allocation3], %s1009_s28, %s1009_s28, %s1010_s29  }
  0x12   :  { %s1011_s7 = smov [#allocation4]   ;;  %s982_s11 = scalar_lea.hbm %s1086_s3, 2048 }
  0x13   :  { %s33_s8 = sshll.u32 %s1011_s7, 4  ;;  %p983_p8 = scmp.ne.s32.totalorder %s1086_s3, %s982_s11  ;;  %s34_s8 = int_to_ptr.vmem [resolvable:$true] %s33_s8 }
  0x14   :  { %p986_p9 = scmp.lt.u32.totalorder %s982_s11, %s1086_s3 }
  0x16   :  { %p988_p10 = pnand %p986_p9, %p983_p8 }
  0x18   :  { %991 = shalt.err (!%p988_p10)
}
  0x19   :  { %s992_s16 = scalar_lea.vmem %s34_s8, 2048  ;;  %p997_p12 = scmp.lt.s32.totalorder %s34_s8, %s34_s8 }
  0x1a   :  { %p993_p11 = scmp.ne.s32.totalorder %s34_s8, %s992_s16  ;;  %p998_p13 = scmp.lt.s32.totalorder %s992_s16, %s992_s16 }
  0x1c   :  { %p999_p0 = por %p998_p13, %p997_p12 }
  0x1e   :  { %p1000_p1 = pnand %p999_p0, %p993_p11 }
  0x20   :  { %1003 = shalt.err (!%p1000_p1)
}
  0x21   :  { %s1012_s1 = smov 64   ;;  %s1013_s17 = smov 4  }
  0x22   :  { %39 = dma.hbm_to_vmem [thread:$0]  %s1086_s3, 2048, %s34_s8, [#allocation5], %s1012_s1, %s1012_s1, %s1013_s17  }
  0x23   :  { %1004 = dma.done.wait [#allocation3], 8192  }
  0x24   :  { %1005 = vsyncadd [#allocation3], 4294959104 }
  0x25   :  { %1006 = dma.done.wait [#allocation5], 2048  }
  0x26   :  { %1007 = vsyncadd [#allocation5], 4294965248  ;;  %v844_v0 = vld [vmem:[#allocation2 + $0x4] ss:$8 sps:$4 sm:$0xff]   ;;  %v848_v2 = vld [vmem:[#allocation2] ss:$8 sps:$4 sm:$0xff]  }
  0x27   :  { %v846_v1 = vld [vmem:[#allocation2 + $0x104] ss:$8 sps:$4 sm:$0xff]   ;;  %461 = vmatprep.subr.bf16.mxu1 %v844_v0  ;;  %v849_v3 = vld [vmem:[#allocation2 + $0x100] ss:$8 sps:$4 sm:$0xff]   ;;  %v850_v4 = vld [vmem:[#allocation2 + $0x14] ss:$8 sps:$4 sm:$0xff]  }
  0x28   :  { %502 = vmatprep.subr.bf16.mxu0 %v846_v1  ;;  %462 = vmatpush1.bf16.msra.mxu1 %v848_v2  ;;  %v852_v5 = vld [vmem:[#allocation2 + $0x114] ss:$8 sps:$4 sm:$0xff]   ;;  %v854_v6 = vld [vmem:[#allocation2 + $0x10] ss:$8 sps:$4 sm:$0xff]   ;;  %v856_v8 = vld [vmem:[#allocation2 + $0x24] ss:$8 sps:$4 sm:$0xff]  }
  0x29   :  { %503 = vmatpush1.bf16.msra.mxu0 %v849_v3  ;;  %463 = vmatprep.subr.bf16.mxu1 %v850_v4  ;;  %v855_v7 = vld [vmem:[#allocation2 + $0x110] ss:$8 sps:$4 sm:$0xff]   ;;  %v858_v9 = vld [vmem:[#allocation2 + $0x124] ss:$8 sps:$4 sm:$0xff]   ;;  %v860_v10 = vld [vmem:[#allocation2 + $0x20] ss:$8 sps:$4 sm:$0xff]  }
  0x2a   :  { %504 = vmatprep.subr.bf16.mxu0 %v852_v5  ;;  %v861_v11 = vld [vmem:[#allocation2 + $0x120] ss:$8 sps:$4 sm:$0xff]   ;;  %v862_v12 = vld [vmem:[#allocation2 + $0x34] ss:$8 sps:$4 sm:$0xff]   ;;  %v866_v14 = vld [vmem:[#allocation2 + $0x30] ss:$8 sps:$4 sm:$0xff]  }
  0x2b   :  { %v864_v13 = vld [vmem:[#allocation2 + $0x134] ss:$8 sps:$4 sm:$0xff]   ;;  %v867_v15 = vld [vmem:[#allocation2 + $0x130] ss:$8 sps:$4 sm:$0xff]   ;;  %v868_v16 = vld [vmem:[#allocation2 + $0x44] ss:$8 sps:$4 sm:$0xff]  }
  0x2c   :  { %464 = vmatpush1.bf16.msra.mxu1 %v854_v6  ;;  %v870_v17 = vld [vmem:[#allocation2 + $0x144] ss:$8 sps:$4 sm:$0xff]   ;;  %v872_v18 = vld [vmem:[#allocation2 + $0x40] ss:$8 sps:$4 sm:$0xff]   ;;  %v874_v20 = vld [vmem:[#allocation2 + $0x54] ss:$8 sps:$4 sm:$0xff]  }
  0x2d   :  { %505 = vmatpush1.bf16.msra.mxu0 %v855_v7  ;;  %465 = vmatprep.subr.bf16.mxu1 %v856_v8  ;;  %v873_v19 = vld [vmem:[#allocation2 + $0x140] ss:$8 sps:$4 sm:$0xff]   ;;  %v876_v21 = vld [vmem:[#allocation2 + $0x154] ss:$8 sps:$4 sm:$0xff]   ;;  %v878_v22 = vld [vmem:[#allocation2 + $0x50] ss:$8 sps:$4 sm:$0xff]  }
  0x2e   :  { %506 = vmatprep.subr.bf16.mxu0 %v858_v9  ;;  %v879_v23 = vld [vmem:[#allocation2 + $0x150] ss:$8 sps:$4 sm:$0xff]   ;;  %v880_v24 = vld [vmem:[#allocation2 + $0x64] ss:$8 sps:$4 sm:$0xff]   ;;  %v884_v26 = vld [vmem:[#allocation2 + $0x60] ss:$8 sps:$4 sm:$0xff]  }
  0x2f   :  { %v882_v25 = vld [vmem:[#allocation2 + $0x164] ss:$8 sps:$4 sm:$0xff]   ;;  %v885_v27 = vld [vmem:[#allocation2 + $0x160] ss:$8 sps:$4 sm:$0xff]   ;;  %v886_v28 = vld [vmem:[#allocation2 + $0x74] ss:$8 sps:$4 sm:$0xff]  }
  0x30   :  { %466 = vmatpush1.bf16.msra.mxu1 %v860_v10  ;;  %v888_v29 = vld [vmem:[#allocation2 + $0x174] ss:$8 sps:$4 sm:$0xff]   ;;  %v890_v30 = vld [vmem:[#allocation2 + $0x70] ss:$8 sps:$4 sm:$0xff]   ;;  %v892_v32 = vld [vmem:[#allocation2 + $0x84] ss:$8 sps:$4 sm:$0xff]  }
  0x31   :  { %507 = vmatpush1.bf16.msra.mxu0 %v861_v11  ;;  %467 = vmatprep.subr.bf16.mxu1 %v862_v12  ;;  %v891_v31 = vld [vmem:[#allocation2 + $0x170] ss:$8 sps:$4 sm:$0xff]   ;;  %v894_v33 = vld [vmem:[#allocation2 + $0x184] ss:$8 sps:$4 sm:$0xff]   ;;  %v896_v34 = vld [vmem:[#allocation2 + $0x80] ss:$8 sps:$4 sm:$0xff]  }
  0x32   :  { %508 = vmatprep.subr.bf16.mxu0 %v864_v13  ;;  %v897_v35 = vld [vmem:[#allocation2 + $0x180] ss:$8 sps:$4 sm:$0xff]   ;;  %v898_v36 = vld [vmem:[#allocation2 + $0x94] ss:$8 sps:$4 sm:$0xff]   ;;  %v902_v38 = vld [vmem:[#allocation2 + $0x90] ss:$8 sps:$4 sm:$0xff]  }
  0x33   :  { %v900_v37 = vld [vmem:[#allocation2 + $0x194] ss:$8 sps:$4 sm:$0xff]   ;;  %v903_v39 = vld [vmem:[#allocation2 + $0x190] ss:$8 sps:$4 sm:$0xff]   ;;  %v904_v40 = vld [vmem:[#allocation2 + $0xa4] ss:$8 sps:$4 sm:$0xff]  }
  0x34   :  { %468 = vmatpush1.bf16.msra.mxu1 %v866_v14  ;;  %v906_v41 = vld [vmem:[#allocation2 + $0x1a4] ss:$8 sps:$4 sm:$0xff]   ;;  %v908_v42 = vld [vmem:[#allocation2 + $0xa0] ss:$8 sps:$4 sm:$0xff]   ;;  %v910_v44 = vld [vmem:[#allocation2 + $0xb4] ss:$8 sps:$4 sm:$0xff]  }
  0x35   :  { %509 = vmatpush1.bf16.msra.mxu0 %v867_v15  ;;  %469 = vmatprep.subr.bf16.mxu1 %v868_v16  ;;  %v909_v43 = vld [vmem:[#allocation2 + $0x1a0] ss:$8 sps:$4 sm:$0xff]   ;;  %v912_v45 = vld [vmem:[#allocation2 + $0x1b4] ss:$8 sps:$4 sm:$0xff]   ;;  %v914_v46 = vld [vmem:[#allocation2 + $0xb0] ss:$8 sps:$4 sm:$0xff]  }
  0x36   :  { %510 = vmatprep.subr.bf16.mxu0 %v870_v17  ;;  %v915_v47 = vld [vmem:[#allocation2 + $0x1b0] ss:$8 sps:$4 sm:$0xff]   ;;  %v49_v48 = vld [vmem:[%s1083_s0] sm:$0xff]  ;;  %v50_v50 = vld [vmem:[%s1083_s0 + $0x8] sm:$0xff] }
  0x37   :  { %v728_v49 = vcombine.high %v49_v48, %v49_v48  ;;  %v916_v51 = vld [vmem:[#allocation2 + $0xc4] ss:$8 sps:$4 sm:$0xff]   ;;  %v730_v52 = vcombine.high %v50_v50, %v50_v50  ;;  %v920_v54 = vld [vmem:[#allocation2 + $0xc0] ss:$8 sps:$4 sm:$0xff]   ;;  %v922_v56 = vld [vmem:[#allocation2 + $0xd4] ss:$8 sps:$4 sm:$0xff]   ;;  %v727_v5 = vcombine.low %v49_v48, %v49_v48  ;;  %v729_v6 = vcombine.low %v50_v50, %v50_v50 }
  0x38   :  { %470 = vmatpush1.bf16.msra.mxu1 %v872_v18  ;;  %v918_v53 = vld [vmem:[#allocation2 + $0x1c4] ss:$8 sps:$4 sm:$0xff]   ;;  %v921_v55 = vld [vmem:[#allocation2 + $0x1c0] ss:$8 sps:$4 sm:$0xff]   ;;  %v924_v57 = vld [vmem:[#allocation2 + $0x1d4] ss:$8 sps:$4 sm:$0xff]  }
  0x39   :  { %511 = vmatpush1.bf16.msra.mxu0 %v873_v19  ;;  %471 = vmatprep.subr.bf16.mxu1 %v874_v20  ;;  %v926_v58 = vld [vmem:[#allocation2 + $0xd0] ss:$8 sps:$4 sm:$0xff]   ;;  %v928_v60 = vld [vmem:[#allocation2 + $0xe4] ss:$8 sps:$4 sm:$0xff]   ;;  %v932_v62 = vld [vmem:[#allocation2 + $0xe0] ss:$8 sps:$4 sm:$0xff]  }
  0x3a   :  { %512 = vmatprep.subr.bf16.mxu0 %v876_v21  ;;  %493 = vmatprep.mubr.bf16.mxu1 %v728_v49  ;;  %v927_v59 = vld [vmem:[#allocation2 + $0x1d0] ss:$8 sps:$4 sm:$0xff]   ;;  %v930_v61 = vld [vmem:[#allocation2 + $0x1e4] ss:$8 sps:$4 sm:$0xff]   ;;  %v933_v63 = vld [vmem:[#allocation2 + $0x1e0] ss:$8 sps:$4 sm:$0xff]  }
  0x3b   :  { %534 = vmatprep.mubr.bf16.mxu0 %v730_v52  ;;  %v934_v0 = vld [vmem:[#allocation2 + $0xf4] ss:$8 sps:$4 sm:$0xff]   ;;  %v938_v2 = vld [vmem:[#allocation2 + $0xf0] ss:$8 sps:$4 sm:$0xff]   ;;  %v944_v4 = vld [vmem:[#allocation4 + $0x40] sm:$0xff]  }
  0x3c   :  { %472 = vmatpush1.bf16.msra.mxu1 %v878_v22  ;;  %v936_v1 = vld [vmem:[#allocation2 + $0x1f4] ss:$8 sps:$4 sm:$0xff]   ;;  %v939_v3 = vld [vmem:[#allocation2 + $0x1f0] ss:$8 sps:$4 sm:$0xff]   ;;  %v945_v7 = vld [vmem:[#allocation4] sm:$0xff]   ;;  %v117_v22 = vlaneseq }
  0x3d   :  { %513 = vmatpush1.bf16.msra.mxu0 %v879_v23  ;;  %473 = vmatprep.subr.bf16.mxu1 %v880_v24  ;;  %v946_v8 = vld [vmem:[#allocation4 + $0x48] sm:$0xff]   ;;  %v948_v10 = vld [vmem:[#allocation4 + $0x50] sm:$0xff]   ;;  %v950_v12 = vld [vmem:[#allocation4 + $0x58] sm:$0xff]  }
  0x3e   :  { %514 = vmatprep.subr.bf16.mxu0 %v882_v25  ;;  %v947_v9 = vld [vmem:[#allocation4 + $0x8] sm:$0xff]   ;;  %v949_v11 = vld [vmem:[#allocation4 + $0x10] sm:$0xff]   ;;  %v951_v13 = vld [vmem:[#allocation4 + $0x18] sm:$0xff]   ;;  %v118_v23 = vshrl.u32 %v117_v22, 7 }
  0x3f   :  { %v952_v14 = vld [vmem:[#allocation4 + $0x60] sm:$0xff]   ;;  %v954_v16 = vld [vmem:[#allocation4 + $0x68] sm:$0xff]   ;;  %v956_v18 = vld [vmem:[#allocation4 + $0x70] sm:$0xff]  }
  0x40   :  { %474 = vmatpush1.bf16.msra.mxu1 %v884_v26  ;;  %v953_v15 = vld [vmem:[#allocation4 + $0x20] sm:$0xff]   ;;  %v955_v17 = vld [vmem:[#allocation4 + $0x28] sm:$0xff]   ;;  %v957_v19 = vld [vmem:[#allocation4 + $0x30] sm:$0xff]   ;;  %v119_v24 = vsub.s32 0, %v118_v23  ;;  %v123_v26 = vsub.s32 1, %v118_v23 }
  0x41   :  { %515 = vmatpush1.bf16.msra.mxu0 %v885_v27  ;;  %475 = vmatprep.subr.bf16.mxu1 %v886_v28  ;;  %v958_v20 = vld [vmem:[#allocation4 + $0x78] sm:$0xff]   ;;  %v115_v25 = vld [vmem:[%s1085_s2] sm:$0x3] }
  0x42   :  { %516 = vmatprep.subr.bf16.mxu0 %v888_v29  ;;  %v959_v21 = vld [vmem:[#allocation4 + $0x38] sm:$0xff]   ;;  %v120_v27 = vrot.slane %v115_v25, %v119_v24  ;;  %v124_v28 = vrot.slane %v115_v25, %v123_v26 }
  0x44   :  { %476 = vmatpush1.bf16.msra.mxu1 %v890_v30 }
  0x45   :  { %517 = vmatpush1.bf16.msra.mxu0 %v891_v31  ;;  %477 = vmatprep.subr.bf16.mxu1 %v892_v32 }
  0x46   :  { %518 = vmatprep.subr.bf16.mxu0 %v894_v33 }
  0x48   :  { %478 = vmatpush1.bf16.msra.mxu1 %v896_v34 }
  0x49   :  { %519 = vmatpush1.bf16.msra.mxu0 %v897_v35  ;;  %479 = vmatprep.subr.bf16.mxu1 %v898_v36 }
  0x4a   :  { %520 = vmatprep.subr.bf16.mxu0 %v900_v37 }
  0x4c   :  { %480 = vmatpush1.bf16.msra.mxu1 %v902_v38 }
  0x4d   :  { %521 = vmatpush1.bf16.msra.mxu0 %v903_v39  ;;  %481 = vmatprep.subr.bf16.mxu1 %v904_v40 }
  0x4e   :  { %522 = vmatprep.subr.bf16.mxu0 %v906_v41 }
  0x50   :  { %482 = vmatpush1.bf16.msra.mxu1 %v908_v42 }
  0x51   :  { %523 = vmatpush1.bf16.msra.mxu0 %v909_v43  ;;  %483 = vmatprep.subr.bf16.mxu1 %v910_v44  ;;  %v795_v44 = vld [vmem:[%s1087_s4] ss:$0 sm:$0xff] }
  0x52   :  { %524 = vmatprep.subr.bf16.mxu0 %v912_v45 }
  0x54   :  { %484 = vmatpush1.bf16.msra.mxu1 %v914_v46 }
  0x55   :  { %525 = vmatpush1.bf16.msra.mxu0 %v915_v47  ;;  %485 = vmatprep.subr.bf16.mxu1 %v916_v51 }
  0x56   :  { %526 = vmatprep.subr.bf16.mxu0 %v918_v53 }
  0x58   :  { %486 = vmatpush1.bf16.msra.mxu1 %v920_v54 }
  0x59   :  { %527 = vmatpush1.bf16.msra.mxu0 %v921_v55  ;;  %487 = vmatprep.subr.bf16.mxu1 %v922_v56 }
  0x5a   :  { %528 = vmatprep.subr.bf16.mxu0 %v924_v57 }
  0x5c   :  { %488 = vmatpush1.bf16.msra.mxu1 %v926_v58 }
  0x5d   :  { %529 = vmatpush1.bf16.msra.mxu0 %v927_v59  ;;  %489 = vmatprep.subr.bf16.mxu1 %v928_v60 }
  0x5e   :  { %530 = vmatprep.subr.bf16.mxu0 %v930_v61 }
  0x60   :  { %490 = vmatpush1.bf16.msra.mxu1 %v932_v62 }
  0x61   :  { %531 = vmatpush1.bf16.msra.mxu0 %v933_v63  ;;  %491 = vmatprep.subr.bf16.mxu1 %v934_v0 }
  0x62   :  { %532 = vmatprep.subr.bf16.mxu0 %v936_v1 }
  0x64   :  { %492 = vmatpush1.bf16.msra.mxu1 %v938_v2 }
  0x65   :  { %533 = vmatpush1.bf16.msra.mxu0 %v939_v3  ;;  %812 = vmatprep.subr.bf16.mxu1 %v944_v4 }
  0x67   :  { %494 = vmatmul.mubr.bf16.vlgmr.msra.gmra.mrb[0].mxu1 %v727_v5 }
  0x68   :  { %535 = vmatmul.mubr.bf16.vlgmr.msra.gmra.mrb[0].mxu0 %v729_v6  ;;  %813 = vmatpush3.bf16.msra.mxu1 %v945_v7 }
  0x69   :  { %814 = vmatprep.subr.bf16.mxu1 %v946_v8 }
  0x6c   :  { %815 = vmatpush3.bf16.msra.mxu1 %v947_v9 }
  0x6d   :  { %816 = vmatprep.subr.bf16.mxu1 %v948_v10 }
  0x70   :  { %817 = vmatpush3.bf16.msra.mxu1 %v949_v11 }
  0x71   :  { %818 = vmatprep.subr.bf16.mxu1 %v950_v12 }
  0x74   :  { %819 = vmatpush3.bf16.msra.mxu1 %v951_v13 }
  0x75   :  { %820 = vmatprep.subr.bf16.mxu1 %v952_v14 }
  0x78   :  { %821 = vmatpush3.bf16.msra.mxu1 %v953_v15 }
  0x79   :  { %822 = vmatprep.subr.bf16.mxu1 %v954_v16 }
  0x7c   :  { %823 = vmatpush3.bf16.msra.mxu1 %v955_v17 }
  0x7d   :  { %824 = vmatprep.subr.bf16.mxu1 %v956_v18 }
  0x80   :  { %825 = vmatpush3.bf16.msra.mxu1 %v957_v19 }
  0x81   :  { %826 = vmatprep.subr.bf16.mxu1 %v958_v20 }
  0x84   :  { %827 = vmatpush3.bf16.msra.mxu1 %v959_v21 }
 0x13a   :  { %v495_v29 = vpop.f32.mrb[0].mxu1 }
 0x13b   :  { %v536_v30 = vpop.f32.mrb[0].mxu0  ;;  %v496_v31 = vadd.f32 %v495_v29, %v120_v27  ;;  %v497_v32 = vpop.f32.mrb[1].mxu1 }
 0x13c   :  { %v538_v33 = vpop.f32.mrb[1].mxu0  ;;  %v498_v34 = vadd.f32 %v497_v32, %v124_v28  ;;  %v499_v35 = vpop.f32.mrb[2].mxu1 }
 0x13d   :  { %v540_v36 = vpop.f32.mrb[2].mxu0  ;;  %v537_v37 = vadd.f32 %v536_v30, %v496_v31  ;;  %v500_v38 = vpop.f32.mrb[3].mxu1 }
 0x13e   :  { %v541_v39 = vpop.f32.mrb[3].mxu0  ;;  %v539_v40 = vadd.f32 %v538_v33, %v498_v34 }
 0x13f   :  { %v543_v42 = vpack.c.bf16 %v537_v37, %v537_v37 }
 0x140   :  { %v544_v41 = vpack.c.bf16 %v539_v40, %v539_v40 }
 0x142   :  { %712 = vmatprep.mubr.bf16.mxu1 %v544_v41 }
 0x143   :  { %713 = vmatmul.mubr.bf16.vlgmr.msra.gmra.mrb[4].mxu1 %v543_v42 }
 0x216   :  { %v828_v43 = vpop.f32.mrb[4].mxu1 }
 0x217   :  { %v829_v45 = vpop.f32.mrb[5].mxu1 }
 0x218   :  { %v830_v46 = vadd.f32 %v829_v45, %v828_v43  ;;  %v831_v47 = vpop.f32.mrb[6].mxu1 }
 0x219   :  { %v832_v48 = vpop.f32.mrb[7].mxu1 }
 0x21a   :  { %v715_v49 = vadd.f32 %v830_v46, %v795_v44 }
 0x21c   :  { %720 = vst [vmem:[%s1088_s5] sm:$0xff] %v715_v49 }
 0x21d   :  { %725 = vsyncpa [#allocation3], 1 }
 0x21e   :  { %726 = vsyncpa [#allocation5], 1 }

</bundles_post_ra>
